<compile_context>
chip_gen: v5e
topology: v5e:2x2
jax: 0.10.0
libtpu: 0.0.40
codegen_flags: <defaults>
</compile_context>

<pallas_src>
import functools
from typing import NamedTuple, Tuple

import jax
import jax.numpy as jnp
from jax.experimental import pallas as pl
from jax.experimental.pallas import tpu as pltpu

LANE = 128     # vreg lane width  (last dim)
SUBLANE = 8    # vreg sublane width (second-to-last dim)


def _round_up(x: int, m: int) -> int:
    return ((x + m - 1) // m) * m


# --------------------------------------------------------------------------
# Fused kernel: x -> (Linear [+ ReLU]) * L, all in one body.
# refs = (x_ref, w0_ref, b0_ref, w1_ref, b1_ref, ..., o_ref)
# --------------------------------------------------------------------------
def _make_mlp_kernel(num_layers: int):
    def kernel(*refs):
        x_ref = refs[0]
        o_ref = refs[1 + 2 * num_layers]
        h = x_ref[...].astype(jnp.float32)      # (tb, in) activation, never leaves VMEM/vregs
        for i in range(num_layers):
            w = refs[1 + 2 * i][...]            # (in_pad_i, out_pad_i), bf16 (or f32)
            b = refs[2 + 2 * i][...]            # (1, out_pad_i), f32 -> broadcasts
            # bf16 (or f32) MXU operands, f32 accumulation; bias + ReLU in f32.
            y = jnp.dot(h.astype(w.dtype), w,
                        preferred_element_type=jnp.float32) + b
            if i < num_layers - 1:              # trailing ReLU was popped in the module
                y = jnp.maximum(y, 0.0)
            h = y
        o_ref[...] = h.astype(o_ref.dtype)      # single cast at the store

    return kernel


# --------------------------------------------------------------------------
# Parameter construction (PyTorch nn.Linear-style init) and one-time prep.
# --------------------------------------------------------------------------
def init_mlp_params(key, input_size, output_size, hidden_sizes=None):
    """Raw params in PyTorch layout: weight (out, in), bias (out,).
    Init mirrors nn.Linear defaults: U(-1/sqrt(fan_in), 1/sqrt(fan_in))."""
    if hidden_sizes is None:
        hidden_sizes = []
    sizes = [input_size] + list(hidden_sizes) + [output_size]
    params = []
    for i in range(len(sizes) - 1):
        fan_in, fan_out = sizes[i], sizes[i + 1]
        key, kw, kb = jax.random.split(key, 3)
        bound = 1.0 / (fan_in ** 0.5)
        w = jax.random.uniform(kw, (fan_out, fan_in), jnp.float32, -bound, bound)
        b = jax.random.uniform(kb, (fan_out,), jnp.float32, -bound, bound)
        params.append((w, b))
    return params


class PreparedMLP(NamedTuple):
    layers: Tuple       # tuple of (w (in_pad, out_pad) compute-dtype, b (1, out_pad) f32)
    input_size: int
    output_size: int


def prepare_params(raw_params, input_size, output_size, compute_dtype=jnp.bfloat16):
    """One-time (build-time) transpose + zero-pad to lane-dense shapes + dtype cast.
    Zero padding is exact: padded input columns are zero and padded weight rows/cols and
    bias lanes are zero, so padded lanes carry exactly 0 through every layer (ReLU(0)=0)."""
    layers = []
    for li, (w, b) in enumerate(raw_params):
        out_f, in_f = w.shape
        w_t = jnp.asarray(w, jnp.float32).T                       # (in, out)
        # Layer 0 input width padded to a sublane multiple; later layers must match the
        # previous layer's 128-padded output width.
        in_pad = _round_up(in_f, SUBLANE) if li == 0 else _round_up(in_f, LANE)
        out_pad = _round_up(out_f, LANE)
        w_p = jnp.zeros((in_pad, out_pad), jnp.float32).at[:in_f, :out_f].set(w_t)
        w_p = w_p.astype(compute_dtype)                           # bf16 MXU operand
        b_p = jnp.zeros((1, out_pad), jnp.float32).at[0, :out_f].set(
            jnp.asarray(b, jnp.float32))                          # bias stays f32
        layers.append((w_p, b_p))
    return PreparedMLP(tuple(layers), int(input_size), int(output_size))


# --------------------------------------------------------------------------
# Tile / VMEM budgeting helpers.
# --------------------------------------------------------------------------
def _physical_vmem_bytes() -> int:
    try:
        return int(pltpu.get_tpu_info().vmem_capacity_bytes)
    except Exception:
        return 64 << 20   # conservative: v7x per-TensorCore VMEM


def _choose_batch_tile(batch, requested, widths, act_budget_bytes=24 << 20):
    """MXU-shape-aligned batch tile, >=2 grid steps for large batches, VMEM-clamped."""
    pb8 = _round_up(max(batch, 1), SUBLANE)
    per_row = sum(widths) * 4 * 2            # f32 activations, x/out double-buffered
    if pb8 <= 256:
        tb = pb8                             # one small block; nothing to split
    else:
        tb = min(requested, pb8)
        tb = max(256, (tb // 256) * 256)     # multiple of 256 (2x256^2 MXU)
        if pl.cdiv(pb8, tb) < 2:             # give v7x's 2nd TensorCore work
            tb = max(256, 256 * pl.cdiv(pl.cdiv(pb8, 2), 256))
    while tb > SUBLANE and tb * per_row > act_budget_bytes:
        tb = max(SUBLANE, _round_up(tb // 2, SUBLANE))
    return tb


def _vmem_limit_bytes(layers, tb, widths, single_buffer_weights=True):
    wbytes = sum(int(w.size) * w.dtype.itemsize + int(b.size) * b.dtype.itemsize
                 for w, b in layers)
    if not single_buffer_weights:
        wbytes *= 2
    abytes = tb * sum(widths) * 4 * 2
    est = wbytes + abytes + (2 << 20)        # headroom for compiler scratch
    phys = _physical_vmem_bytes()
    return int(min(phys * 3 // 4, max(est, 16 << 20)))


# --------------------------------------------------------------------------
# Forward wrapper: one pallas_call for the whole MLP, batch-gridded.
# --------------------------------------------------------------------------
def mlp_forward(prepared: PreparedMLP, x, *, block_batch: int = 512):
    layers = prepared.layers
    num_layers = len(layers)
    batch, in_f = x.shape
    assert in_f == prepared.input_size

    # Layer-0 input width padded to a sublane multiple (w0 rows already padded to match).
    in_pad0 = layers[0][0].shape[0]
    if in_pad0 != in_f:
        x = jnp.pad(x, ((0, 0), (0, in_pad0 - in_f)))

    out_pad = layers[-1][0].shape[1]
    widths = [in_pad0] + [w.shape[1] for w, _ in layers]

    tb = _choose_batch_tile(batch, block_batch, widths)
    grid = pl.cdiv(batch, tb)                # no batch padding; ragged last block is masked

    flat_params = []
    for w, b in layers:
        flat_params.extend((w, b))

    def build_in_specs(single_buffer):
        specs = [pl.BlockSpec((tb, in_pad0), lambda i: (i, 0))]   # x: double-buffered
        for w, b in layers:
            if single_buffer:
                # Grid-invariant blocks: single-buffer to halve resident weight VMEM.
                specs.append(pl.BlockSpec(w.shape, lambda i: (0, 0),
                                          pipeline_mode=pl.Buffered(1)))
                specs.append(pl.BlockSpec(b.shape, lambda i: (0, 0),
                                          pipeline_mode=pl.Buffered(1)))
            else:
                specs.append(pl.BlockSpec(w.shape, lambda i: (0, 0)))
                specs.append(pl.BlockSpec(b.shape, lambda i: (0, 0)))
        return specs

    def run(single_buffer):
        return pl.pallas_call(
            _make_mlp_kernel(num_layers),
            out_shape=jax.ShapeDtypeStruct((batch, out_pad), x.dtype),
            grid=(grid,),
            in_specs=build_in_specs(single_buffer),
            out_specs=pl.BlockSpec((tb, out_pad), lambda i: (i, 0)),
            compiler_params=pltpu.CompilerParams(
                dimension_semantics=("parallel",),
                vmem_limit_bytes=_vmem_limit_bytes(layers, tb, widths, single_buffer)),
        )(x, *flat_params)

    try:
        out = run(single_buffer=True)
    except Exception:
        # Fallback if this Pallas build rejects single-buffered invariant blocks.
        out = run(single_buffer=False)

    # Strip lane padding only (no batch padding was added).
    return out[:, :prepared.output_size]


# --------------------------------------------------------------------------
# Pure-JAX references (raw PyTorch-layout params).
# --------------------------------------------------------------------------
def mlp_reference(raw_params, x, compute_dtype=jnp.float32):
    """Same math as the kernel: dot operands in compute_dtype, f32 accumulate/bias/ReLU."""
    n = len(raw_params)
    h = x.astype(jnp.float32)
    for i, (w, b) in enumerate(raw_params):
        wd = w.T.astype(compute_dtype)
        h = jnp.dot(h.astype(compute_dtype), wd,
                    preferred_element_type=jnp.float32) + b
        if i < n - 1:
            h = jnp.maximum(h, 0.0)
    return h


if __name__ == "__main__":
    key = jax.random.PRNGKey(0)
    k_params, k_x = jax.random.split(key)

    input_size = 32
    hidden_sizes = [64, 64]
    output_size = 16
    batch = 8

    raw_params = init_mlp_params(k_params, input_size, output_size, hidden_sizes)
    x = jax.random.normal(k_x, (batch, input_size), jnp.float32)

    # --- bf16-weight fused kernel (default, fast path) ---------------------
    prepared_bf16 = prepare_params(raw_params, input_size, output_size,
                                   compute_dtype=jnp.bfloat16)
    out_bf16 = mlp_forward(prepared_bf16, x)
    jax.block_until_ready(out_bf16)
    assert out_bf16.shape == (batch, output_size)
    ref_bf16 = mlp_reference(raw_params, x, compute_dtype=jnp.bfloat16)
    ref_f32 = mlp_reference(raw_params, x, compute_dtype=jnp.float32)
    assert jnp.allclose(out_bf16, ref_bf16, atol=1e-4, rtol=1e-4)   # matches bf16 math
    assert jnp.allclose(out_bf16, ref_f32, atol=5e-2, rtol=5e-2)    # close to exact math

    # --- f32 path (exactness check of the fused structure) -----------------
    prepared_f32 = prepare_params(raw_params, input_size, output_size,
                                  compute_dtype=jnp.float32)
    out_f32 = mlp_forward(prepared_f32, x)
    jax.block_until_ready(out_f32)
    assert jnp.allclose(out_f32, ref_f32, atol=1e-5, rtol=1e-5)

    # --- no-hidden-layer path (single Linear, no ReLU) ----------------------
    raw2 = init_mlp_params(k_params, input_size, output_size, [])
    prep2 = prepare_params(raw2, input_size, output_size, compute_dtype=jnp.float32)
    out2 = mlp_forward(prep2, x)
    jax.block_until_ready(out2)
    assert jnp.allclose(out2, mlp_reference(raw2, x), atol=1e-5, rtol=1e-5)

    print("KERNEL_OK")
</pallas_src>

<mosaic_0001>
module attributes {stable_mosaic.version = 11 : i64} {
  func.func @kernel(%arg0: i32, %arg1: memref<8x32xf32, #tpu.memory_space<vmem>>, %arg2: memref<32x128xbf16, #tpu.memory_space<vmem>>, %arg3: memref<1x128xf32, #tpu.memory_space<vmem>>, %arg4: memref<128x128xbf16, #tpu.memory_space<vmem>>, %arg5: memref<1x128xf32, #tpu.memory_space<vmem>>, %arg6: memref<128x128xbf16, #tpu.memory_space<vmem>>, %arg7: memref<1x128xf32, #tpu.memory_space<vmem>>, %arg8: memref<8x128xf32, #tpu.memory_space<vmem>>) attributes {dimension_semantics = [#tpu.dimension_semantics<parallel>], iteration_bounds = array<i64: 1>, scalar_prefetch = 0 : i64, scratch_operands = 0 : i64, tpu.core_type = #tpu.core_type<tc>, window_params = [{transform_indices = @transform_0, window_bounds = array<i64: 8, 32>}, {pipeline_mode = #tpu.pipeline_mode<synchronous>, transform_indices = @transform_1, window_bounds = array<i64: 32, 128>}, {pipeline_mode = #tpu.pipeline_mode<synchronous>, transform_indices = @transform_2, window_bounds = array<i64: 1, 128>}, {pipeline_mode = #tpu.pipeline_mode<synchronous>, transform_indices = @transform_3, window_bounds = array<i64: 128, 128>}, {pipeline_mode = #tpu.pipeline_mode<synchronous>, transform_indices = @transform_4, window_bounds = array<i64: 1, 128>}, {pipeline_mode = #tpu.pipeline_mode<synchronous>, transform_indices = @transform_5, window_bounds = array<i64: 128, 128>}, {pipeline_mode = #tpu.pipeline_mode<synchronous>, transform_indices = @transform_6, window_bounds = array<i64: 1, 128>}, {transform_indices = @transform_7, window_bounds = array<i64: 8, 128>}]} {
    %c0 = arith.constant 0 : index
    %c0_0 = arith.constant 0 : index
    %0 = vector.load %arg1[%c0, %c0_0] : memref<8x32xf32, #tpu.memory_space<vmem>>, vector<8x32xf32>
    %c0_1 = arith.constant 0 : index
    %c0_2 = arith.constant 0 : index
    %1 = vector.load %arg2[%c0_1, %c0_2] : memref<32x128xbf16, #tpu.memory_space<vmem>>, vector<32x128xbf16>
    %c0_3 = arith.constant 0 : index
    %c0_4 = arith.constant 0 : index
    %2 = vector.load %arg3[%c0_3, %c0_4] : memref<1x128xf32, #tpu.memory_space<vmem>>, vector<1x128xf32>
    %3 = arith.truncf %0 : vector<8x32xf32> to vector<8x32xbf16>
    %cst = arith.constant dense<0.000000e+00> : vector<8x128xf32>
    %4 = tpu.matmul %3, %1, %cst {dimension_numbers = #tpu.dot_dimension_numbers<[1], [0], [0], [1], [0, 0, 1, 1], [], []>} : vector<8x32xbf16>, vector<32x128xbf16>, vector<8x128xf32> -> vector<8x128xf32>
    %5 = vector.broadcast %2 : vector<1x128xf32> to vector<8x128xf32>
    %6 = arith.addf %4, %5 : vector<8x128xf32>
    %cst_5 = arith.constant 0.000000e+00 : f32
    %7 = vector.broadcast %cst_5 : f32 to vector<8x128xf32>
    %8 = arith.maximumf %6, %7 : vector<8x128xf32>
    %c0_6 = arith.constant 0 : index
    %c0_7 = arith.constant 0 : index
    %9 = vector.load %arg4[%c0_6, %c0_7] : memref<128x128xbf16, #tpu.memory_space<vmem>>, vector<128x128xbf16>
    %c0_8 = arith.constant 0 : index
    %c0_9 = arith.constant 0 : index
    %10 = vector.load %arg5[%c0_8, %c0_9] : memref<1x128xf32, #tpu.memory_space<vmem>>, vector<1x128xf32>
    %11 = arith.truncf %8 : vector<8x128xf32> to vector<8x128xbf16>
    %cst_10 = arith.constant dense<0.000000e+00> : vector<8x128xf32>
    %12 = tpu.matmul %11, %9, %cst_10 {dimension_numbers = #tpu.dot_dimension_numbers<[1], [0], [0], [1], [0, 0, 1, 1], [], []>} : vector<8x128xbf16>, vector<128x128xbf16>, vector<8x128xf32> -> vector<8x128xf32>
    %13 = vector.broadcast %10 : vector<1x128xf32> to vector<8x128xf32>
    %14 = arith.addf %12, %13 : vector<8x128xf32>
    %cst_11 = arith.constant 0.000000e+00 : f32
    %15 = vector.broadcast %cst_11 : f32 to vector<8x128xf32>
    %16 = arith.maximumf %14, %15 : vector<8x128xf32>
    %c0_12 = arith.constant 0 : index
    %c0_13 = arith.constant 0 : index
    %17 = vector.load %arg6[%c0_12, %c0_13] : memref<128x128xbf16, #tpu.memory_space<vmem>>, vector<128x128xbf16>
    %c0_14 = arith.constant 0 : index
    %c0_15 = arith.constant 0 : index
    %18 = vector.load %arg7[%c0_14, %c0_15] : memref<1x128xf32, #tpu.memory_space<vmem>>, vector<1x128xf32>
    %19 = arith.truncf %16 : vector<8x128xf32> to vector<8x128xbf16>
    %cst_16 = arith.constant dense<0.000000e+00> : vector<8x128xf32>
    %20 = tpu.matmul %19, %17, %cst_16 {dimension_numbers = #tpu.dot_dimension_numbers<[1], [0], [0], [1], [0, 0, 1, 1], [], []>} : vector<8x128xbf16>, vector<128x128xbf16>, vector<8x128xf32> -> vector<8x128xf32>
    %21 = vector.broadcast %18 : vector<1x128xf32> to vector<8x128xf32>
    %22 = arith.addf %20, %21 : vector<8x128xf32>
    %c0_17 = arith.constant 0 : index
    %c0_18 = arith.constant 0 : index
    %23 = vector.load %arg8[%c0_17, %c0_18] : memref<8x128xf32, #tpu.memory_space<vmem>>, vector<8x128xf32>
    tpu.vector_store %arg8[%c0_17, %c0_18], %22 {strides = array<i32>} : memref<8x128xf32, #tpu.memory_space<vmem>>, vector<8x128xf32>,
    return
  }
  func.func @transform_0(%arg0: i32) -> (i32, i32) {
    %c0_i32 = arith.constant 0 : i32
    %c0_i32_0 = arith.constant 0 : i32
    return %arg0, %c0_i32 : i32, i32
  }
  func.func @transform_1(%arg0: i32) -> (i32, i32) {
    %c0_i32 = arith.constant 0 : i32
    %c0_i32_0 = arith.constant 0 : i32
    %c0_i32_1 = arith.constant 0 : i32
    return %c0_i32, %c0_i32_0 : i32, i32
  }
  func.func @transform_2(%arg0: i32) -> (i32, i32) {
    %c0_i32 = arith.constant 0 : i32
    %c0_i32_0 = arith.constant 0 : i32
    %c0_i32_1 = arith.constant 0 : i32
    return %c0_i32, %c0_i32_0 : i32, i32
  }
  func.func @transform_3(%arg0: i32) -> (i32, i32) {
    %c0_i32 = arith.constant 0 : i32
    %c0_i32_0 = arith.constant 0 : i32
    %c0_i32_1 = arith.constant 0 : i32
    return %c0_i32, %c0_i32_0 : i32, i32
  }
  func.func @transform_4(%arg0: i32) -> (i32, i32) {
    %c0_i32 = arith.constant 0 : i32
    %c0_i32_0 = arith.constant 0 : i32
    %c0_i32_1 = arith.constant 0 : i32
    return %c0_i32, %c0_i32_0 : i32, i32
  }
  func.func @transform_5(%arg0: i32) -> (i32, i32) {
    %c0_i32 = arith.constant 0 : i32
    %c0_i32_0 = arith.constant 0 : i32
    %c0_i32_1 = arith.constant 0 : i32
    return %c0_i32, %c0_i32_0 : i32, i32
  }
  func.func @transform_6(%arg0: i32) -> (i32, i32) {
    %c0_i32 = arith.constant 0 : i32
    %c0_i32_0 = arith.constant 0 : i32
    %c0_i32_1 = arith.constant 0 : i32
    return %c0_i32, %c0_i32_0 : i32, i32
  }
  func.func @transform_7(%arg0: i32) -> (i32, i32) {
    %c0_i32 = arith.constant 0 : i32
    %c0_i32_0 = arith.constant 0 : i32
    return %arg0, %c0_i32 : i32, i32
  }
}

module attributes {stable_mosaic.version = 11 : i64} {
  func.func @kernel(%arg0: i32, %arg1: memref<8x32xf32, #tpu.memory_space<vmem>>, %arg2: memref<32x128xbf16, #tpu.memory_space<vmem>>, %arg3: memref<1x128xf32, #tpu.memory_space<vmem>>, %arg4: memref<128x128xbf16, #tpu.memory_space<vmem>>, %arg5: memref<1x128xf32, #tpu.memory_space<vmem>>, %arg6: memref<128x128xbf16, #tpu.memory_space<vmem>>, %arg7: memref<1x128xf32, #tpu.memory_space<vmem>>, %arg8: memref<8x128xf32, #tpu.memory_space<vmem>>) attributes {dimension_semantics = [#tpu.dimension_semantics<parallel>], iteration_bounds = array<i64: 1>, scalar_prefetch = 0 : i64, scratch_operands = 0 : i64, tpu.core_type = #tpu.core_type<tc>, window_params = [{transform_indices = @transform_0, window_bounds = array<i64: 8, 32>}, {pipeline_mode = #tpu.pipeline_mode<synchronous>, transform_indices = @transform_1, window_bounds = array<i64: 32, 128>}, {pipeline_mode = #tpu.pipeline_mode<synchronous>, transform_indices = @transform_2, window_bounds = array<i64: 1, 128>}, {pipeline_mode = #tpu.pipeline_mode<synchronous>, transform_indices = @transform_3, window_bounds = array<i64: 128, 128>}, {pipeline_mode = #tpu.pipeline_mode<synchronous>, transform_indices = @transform_4, window_bounds = array<i64: 1, 128>}, {pipeline_mode = #tpu.pipeline_mode<synchronous>, transform_indices = @transform_5, window_bounds = array<i64: 128, 128>}, {pipeline_mode = #tpu.pipeline_mode<synchronous>, transform_indices = @transform_6, window_bounds = array<i64: 1, 128>}, {transform_indices = @transform_7, window_bounds = array<i64: 8, 128>}]} {
    %c0 = arith.constant 0 : index
    %c0_0 = arith.constant 0 : index
    %0 = vector.load %arg1[%c0, %c0_0] : memref<8x32xf32, #tpu.memory_space<vmem>>, vector<8x32xf32>
    %c0_1 = arith.constant 0 : index
    %c0_2 = arith.constant 0 : index
    %1 = vector.load %arg2[%c0_1, %c0_2] : memref<32x128xbf16, #tpu.memory_space<vmem>>, vector<32x128xbf16>
    %c0_3 = arith.constant 0 : index
    %c0_4 = arith.constant 0 : index
    %2 = vector.load %arg3[%c0_3, %c0_4] : memref<1x128xf32, #tpu.memory_space<vmem>>, vector<1x128xf32>
    %3 = arith.truncf %0 : vector<8x32xf32> to vector<8x32xbf16>
    %cst = arith.constant dense<0.000000e+00> : vector<8x128xf32>
    %4 = tpu.matmul %3, %1, %cst {dimension_numbers = #tpu.dot_dimension_numbers<[1], [0], [0], [1], [0, 0, 1, 1], [], []>} : vector<8x32xbf16>, vector<32x128xbf16>, vector<8x128xf32> -> vector<8x128xf32>
    %5 = vector.broadcast %2 : vector<1x128xf32> to vector<8x128xf32>
    %6 = arith.addf %4, %5 : vector<8x128xf32>
    %cst_5 = arith.constant 0.000000e+00 : f32
    %7 = vector.broadcast %cst_5 : f32 to vector<8x128xf32>
    %8 = arith.maximumf %6, %7 : vector<8x128xf32>
    %c0_6 = arith.constant 0 : index
    %c0_7 = arith.constant 0 : index
    %9 = vector.load %arg4[%c0_6, %c0_7] : memref<128x128xbf16, #tpu.memory_space<vmem>>, vector<128x128xbf16>
    %c0_8 = arith.constant 0 : index
    %c0_9 = arith.constant 0 : index
    %10 = vector.load %arg5[%c0_8, %c0_9] : memref<1x128xf32, #tpu.memory_space<vmem>>, vector<1x128xf32>
    %11 = arith.truncf %8 : vector<8x128xf32> to vector<8x128xbf16>
    %cst_10 = arith.constant dense<0.000000e+00> : vector<8x128xf32>
    %12 = tpu.matmul %11, %9, %cst_10 {dimension_numbers = #tpu.dot_dimension_numbers<[1], [0], [0], [1], [0, 0, 1, 1], [], []>} : vector<8x128xbf16>, vector<128x128xbf16>, vector<8x128xf32> -> vector<8x128xf32>
    %13 = vector.broadcast %10 : vector<1x128xf32> to vector<8x128xf32>
    %14 = arith.addf %12, %13 : vector<8x128xf32>
    %cst_11 = arith.constant 0.000000e+00 : f32
    %15 = vector.broadcast %cst_11 : f32 to vector<8x128xf32>
    %16 = arith.maximumf %14, %15 : vector<8x128xf32>
    %c0_12 = arith.constant 0 : index
    %c0_13 = arith.constant 0 : index
    %17 = vector.load %arg6[%c0_12, %c0_13] : memref<128x128xbf16, #tpu.memory_space<vmem>>, vector<128x128xbf16>
    %c0_14 = arith.constant 0 : index
    %c0_15 = arith.constant 0 : index
    %18 = vector.load %arg7[%c0_14, %c0_15] : memref<1x128xf32, #tpu.memory_space<vmem>>, vector<1x128xf32>
    %19 = arith.truncf %16 : vector<8x128xf32> to vector<8x128xbf16>
    %cst_16 = arith.constant dense<0.000000e+00> : vector<8x128xf32>
    %20 = tpu.matmul %19, %17, %cst_16 {dimension_numbers = #tpu.dot_dimension_numbers<[1], [0], [0], [1], [0, 0, 1, 1], [], []>} : vector<8x128xbf16>, vector<128x128xbf16>, vector<8x128xf32> -> vector<8x128xf32>
    %21 = vector.broadcast %18 : vector<1x128xf32> to vector<8x128xf32>
    %22 = arith.addf %20, %21 : vector<8x128xf32>
    %c0_17 = arith.constant 0 : index
    %c0_18 = arith.constant 0 : index
    %23 = vector.load %arg8[%c0_17, %c0_18] : memref<8x128xf32, #tpu.memory_space<vmem>>, vector<8x128xf32>
    tpu.vector_store %arg8[%c0_17, %c0_18], %22 {strides = array<i32>} : memref<8x128xf32, #tpu.memory_space<vmem>>, vector<8x128xf32>,
    return
  }
  func.func @transform_0(%arg0: i32) -> (i32, i32) {
    %c0_i32 = arith.constant 0 : i32
    %c0_i32_0 = arith.constant 0 : i32
    return %arg0, %c0_i32 : i32, i32
  }
  func.func @transform_1(%arg0: i32) -> (i32, i32) {
    %c0_i32 = arith.constant 0 : i32
    %c0_i32_0 = arith.constant 0 : i32
    %c0_i32_1 = arith.constant 0 : i32
    return %c0_i32, %c0_i32_0 : i32, i32
  }
  func.func @transform_2(%arg0: i32) -> (i32, i32) {
    %c0_i32 = arith.constant 0 : i32
    %c0_i32_0 = arith.constant 0 : i32
    %c0_i32_1 = arith.constant 0 : i32
    return %c0_i32, %c0_i32_0 : i32, i32
  }
  func.func @transform_3(%arg0: i32) -> (i32, i32) {
    %c0_i32 = arith.constant 0 : i32
    %c0_i32_0 = arith.constant 0 : i32
    %c0_i32_1 = arith.constant 0 : i32
    return %c0_i32, %c0_i32_0 : i32, i32
  }
  func.func @transform_4(%arg0: i32) -> (i32, i32) {
    %c0_i32 = arith.constant 0 : i32
    %c0_i32_0 = arith.constant 0 : i32
    %c0_i32_1 = arith.constant 0 : i32
    return %c0_i32, %c0_i32_0 : i32, i32
  }
  func.func @transform_5(%arg0: i32) -> (i32, i32) {
    %c0_i32 = arith.constant 0 : i32
    %c0_i32_0 = arith.constant 0 : i32
    %c0_i32_1 = arith.constant 0 : i32
    return %c0_i32, %c0_i32_0 : i32, i32
  }
  func.func @transform_6(%arg0: i32) -> (i32, i32) {
    %c0_i32 = arith.constant 0 : i32
    %c0_i32_0 = arith.constant 0 : i32
    %c0_i32_1 = arith.constant 0 : i32
    return %c0_i32, %c0_i32_0 : i32, i32
  }
  func.func @transform_7(%arg0: i32) -> (i32, i32) {
    %c0_i32 = arith.constant 0 : i32
    %c0_i32_0 = arith.constant 0 : i32
    return %arg0, %c0_i32 : i32, i32
  }
}

</mosaic_0001>

<bundles_post_ra>
// kernel: tpu_custom_call.1
= control target key start
LH: loop header
LB: loop body
LE: loop exit
PB: predicated region body
PF: predicated region fallthrough
CT: control target
= control target key end

     0   :  { %12 = vsyncpa [#allocation3], 0  ;;  %s614_s0 = inlined_call_operand.hbm [shape: f32[8,32], index: 0, kind: input, shape index: {}]   ;;  %s615_s1 = inlined_call_operand.hbm [shape: bf16[32,128], index: 1, kind: input, shape index: {}]   ;;  %s616_s2 = inlined_call_operand.vmem [shape: f32[1,128], index: 2, kind: input, shape index: {}]   ;;  %s617_s3 = inlined_call_operand.hbm [shape: bf16[128,128], index: 3, kind: input, shape index: {}]   ;;  %s618_s4 = inlined_call_operand.vmem [shape: f32[1,128], index: 4, kind: input, shape index: {}]   ;;  %s619_s5 = inlined_call_operand.hbm [shape: bf16[128,128], index: 5, kind: input, shape index: {}]   ;;  %s620_s6 = inlined_call_operand.vmem [shape: f32[1,128], index: 6, kind: input, shape index: {}]   ;;  %s621_s7 = inlined_call_operand.hbm [shape: f32[8,128], index: 7, kind: output, shape index: {}]  }
   0x1   :  { %13 = vsyncpa [#allocation6], 0 }
   0x2   :  { %14 = vsyncpa [#allocation9], 0  ;;  %s31_s26 = sshll.u32 %s615_s1, 4  ;;  %s32_s26 = int_to_ptr.hbm [resolvable:$true] %s31_s26 }
   0x3   :  { %15 = vsyncpa [#allocation4], 0  ;;  %s543_s27 = smov [#allocation5]   ;;  %s21_s8 = sshll.u32 %s614_s0, 4  ;;  %s22_s8 = int_to_ptr.hbm [resolvable:$true] %s21_s8 }
   0x4   :  { %s33_s28 = sshll.u32 %s543_s27, 4  ;;  %s544_s9 = smov 64   ;;  %s34_s28 = int_to_ptr.vmem [resolvable:$true] %s33_s28 }
   0x5   :  { %s545_s10 = smov 4   ;;  %s546_s11 = smov [#allocation2]  }
   0x6   :  { %39 = dma.hbm_to_vmem [thread:$0]  %s32_s26, 256, %s34_s28, [#allocation6], %s544_s9, %s544_s9, %s545_s10  }
   0x7   :  { %s23_s12 = sshll.u32 %s546_s11, 4  ;;  %s46_s15 = sshll.u32 %s617_s3, 4  ;;  %s24_s12 = int_to_ptr.vmem [resolvable:$true] %s23_s12  ;;  %s47_s15 = int_to_ptr.hbm [resolvable:$true] %s46_s15 }
   0x8   :  { %26 = dma.hbm_to_vmem [thread:$0]  %s22_s8, 128, %s24_s12, [#allocation3]  }
   0x9   :  { %s61_s17 = sshll.u32 %s619_s5, 4  ;;  %s547_s18 = smov [#allocation7]   ;;  %s62_s17 = int_to_ptr.hbm [resolvable:$true] %s61_s17 }
   0xa   :  { %s48_s19 = sshll.u32 %s547_s18, 4  ;;  %s548_s0 = smov [#allocation8]   ;;  %s49_s19 = int_to_ptr.vmem [resolvable:$true] %s48_s19 }
   0xb   :  { %54 = dma.hbm_to_vmem [thread:$0]  %s47_s15, 1024, %s49_s19, [#allocation6], %s544_s9, %s544_s9, %s545_s10  }
   0xc   :  { %s63_s20 = sshll.u32 %s548_s0, 4  ;;  %s64_s20 = int_to_ptr.vmem [resolvable:$true] %s63_s20 }
   0xd   :  { %69 = dma.hbm_to_vmem [thread:$0]  %s62_s17, 1024, %s64_s20, [#allocation9], %s544_s9, %s544_s9, %s545_s10  }
   0xe   :  { %535 = dma.done.wait [#allocation3], 128  }
   0xf   :  { %536 = vsyncadd [#allocation3], 4294967168 }
  0x10   :  { %537 = dma.done.wait [#allocation6], 1280  }
  0x11   :  { %538 = vsyncadd [#allocation6], 4294966016 }
  0x12   :  { %539 = dma.done.wait [#allocation9], 1024  }
  0x13   :  { %540 = vsyncadd [#allocation9], 4294966272  ;;  %v388_v0 = vld [vmem:[#allocation5 + $0x8] sm:$0xff]  ;;  %v387_v2 = vld [vmem:[#allocation5] sm:$0xff]  ;;  %vm111_vm0 = vcmask 261120   ;;  %s549_s24 = smov [#allocation10]  }
  0x14   :  { %v396_v1 = vld [vmem:[#allocation7 + $0x38] sm:$0xff]  ;;  %121 = vmatpush.bf16.msra.mxu0 %v388_v0  ;;  %v89_v3 = vld [vmem:[#allocation2] sm:$0xff]  ;;  %v395_v4 = vld [vmem:[#allocation7 + $0x30] sm:$0xff]  ;;  %s300_s25 = sshll.u32 %s549_s24, 4  ;;  %s302_s28 = sshll.u32 %s621_s7, 4  ;;  %s301_s25 = int_to_ptr.vmem [resolvable:$true] %s300_s25  ;;  %s303_s28 = int_to_ptr.hbm [resolvable:$true] %s302_s28 }
  0x15   :  { %198 = vmatpush.bf16.msra.mxu1 %v396_v1  ;;  %v95_v5 = vpack.c.bf16 %v89_v3, %v89_v3  ;;  %v394_v6 = vld [vmem:[#allocation7 + $0x28] sm:$0xff]  ;;  %v393_v7 = vld [vmem:[#allocation7 + $0x20] sm:$0xff]  ;;  %v392_v8 = vld [vmem:[#allocation7 + $0x18] sm:$0xff] }
  0x16   :  { %v391_v9 = vld [vmem:[#allocation7 + $0x10] sm:$0xff]  ;;  %v390_v10 = vld [vmem:[#allocation7 + $0x8] sm:$0xff]  ;;  %v389_v11 = vld [vmem:[#allocation7] sm:$0xff] }
  0x17   :  { %v404_v12 = vld [vmem:[#allocation8 + $0x38] sm:$0xff]  ;;  %v403_v13 = vld [vmem:[#allocation8 + $0x30] sm:$0xff]  ;;  %v402_v14 = vld [vmem:[#allocation8 + $0x28] sm:$0xff] }
  0x18   :  { %122 = vmatpush.bf16.msra.mxu0 %v387_v2  ;;  %281 = vmatpush.bf16.msra.mxu2 %v404_v12  ;;  %v401_v15 = vld [vmem:[#allocation8 + $0x20] sm:$0xff]  ;;  %v400_v16 = vld [vmem:[#allocation8 + $0x18] sm:$0xff]  ;;  %v399_v17 = vld [vmem:[#allocation8 + $0x10] sm:$0xff] }
  0x19   :  { %199 = vmatpush.bf16.msra.mxu1 %v395_v4  ;;  %v412_v18 = vld [vmem:[%s616_s2] ss:$0 sm:$0xff]  ;;  %v397_v25 = vld [vmem:[#allocation8] sm:$0xff] }
  0x1a   :  { %v398_v24 = vld [vmem:[#allocation8 + $0x8] sm:$0xff] }
  0x1b   :  { %322 = vmatmul.msk.bf16.vlgmr.msra.gmra.mxu0 %vm111_vm0, %v95_v5  ;;  %v413_v26 = vld [vmem:[%s618_s4] ss:$0 sm:$0xff] }
  0x1c   :  { %282 = vmatpush.bf16.msra.mxu2 %v403_v13  ;;  %v414_v32 = vld [vmem:[%s620_s6] ss:$0 sm:$0xff] }
  0x1d   :  { %200 = vmatpush.bf16.msra.mxu1 %v394_v6 }
  0x20   :  { %283 = vmatpush.bf16.msra.mxu2 %v402_v14 }
  0x21   :  { %201 = vmatpush.bf16.msra.mxu1 %v393_v7 }
  0x24   :  { %284 = vmatpush.bf16.msra.mxu2 %v401_v15 }
  0x25   :  { %202 = vmatpush.bf16.msra.mxu1 %v392_v8 }
  0x28   :  { %285 = vmatpush.bf16.msra.mxu2 %v400_v16 }
  0x29   :  { %203 = vmatpush.bf16.msra.mxu1 %v391_v9 }
  0x2c   :  { %286 = vmatpush.bf16.msra.mxu2 %v399_v17 }
  0x2d   :  { %204 = vmatpush.bf16.msra.mxu1 %v390_v10 }
  0x30   :  { %287 = vmatpush.bf16.msra.mxu2 %v398_v24 }
  0x31   :  { %205 = vmatpush.bf16.msra.mxu1 %v389_v11 }
  0x34   :  { %288 = vmatpush.bf16.msra.mxu2 %v397_v25 }
  0x98   :  { %v124_v19 = vpop.f32.mrf.mxu0 }
  0x99   :  { %v125_v20 = vadd.f32 %v412_v18, %v124_v19 }
  0x9b   :  { %v128_v21 = vmax.f32 %v125_v20, 0.0 }
  0x9d   :  { %v146_v22 = vpack.c.bf16 %v128_v21, %v128_v21 }
  0x9f   :  { %206 = vmatmul.bf16.vlgmr.msra.gmra.mxu1 %v146_v22 }
  0xa0   :  { %v126_v23 = vpop.f32.mrf.mxu0 }
 0x11c   :  { %v207_v27 = vpop.f32.mrf.mxu1 }
 0x11d   :  { %v208_v28 = vadd.f32 %v413_v26, %v207_v27 }
 0x11f   :  { %v211_v29 = vmax.f32 %v208_v28, 0.0 }
 0x121   :  { %v229_v30 = vpack.c.bf16 %v211_v29, %v211_v29 }
 0x123   :  { %289 = vmatmul.bf16.vlgmr.msra.gmra.mxu2 %v229_v30 }
 0x124   :  { %v209_v31 = vpop.f32.mrf.mxu1 }
 0x1a6   :  { %v290_v33 = vpop.f32.mrf.mxu2 }
 0x1a7   :  { %v291_v34 = vadd.f32 %v414_v32, %v290_v33 }
 0x1a9   :  { %294 = vst [vmem:[#allocation10] sm:$0xff] %v291_v34 }
 0x1aa   :  { %305 = dma.vmem_to_hbm [thread:$0]  %s301_s25, 128, %s303_s28, [#allocation4]  }
 0x1ae   :  { %v292_v35 = vpop.f32.mrf.mxu2 }
 0x1af   :  { %541 = dma.done.wait [#allocation4], 128  }
 0x1b0   :  { %542 = vsyncadd [#allocation4], 4294967168 }
 0x1b1   :  { %310 = vsyncpa [#allocation3], 1 }
 0x1b2   :  { %311 = vsyncpa [#allocation6], 1 }
 0x1b3   :  { %312 = vsyncpa [#allocation9], 1 }
 0x1b4   :  { %313 = vsyncpa [#allocation4], 1 }

// kernel: tpu_custom_call.1
= control target key start
LH: loop header
LB: loop body
LE: loop exit
PB: predicated region body
PF: predicated region fallthrough
CT: control target
= control target key end

     0   :  { %12 = vsyncpa [#allocation3], 0  ;;  %s614_s0 = inlined_call_operand.hbm [shape: f32[8,32], index: 0, kind: input, shape index: {}]   ;;  %s615_s1 = inlined_call_operand.hbm [shape: bf16[32,128], index: 1, kind: input, shape index: {}]   ;;  %s616_s2 = inlined_call_operand.vmem [shape: f32[1,128], index: 2, kind: input, shape index: {}]   ;;  %s617_s3 = inlined_call_operand.hbm [shape: bf16[128,128], index: 3, kind: input, shape index: {}]   ;;  %s618_s4 = inlined_call_operand.vmem [shape: f32[1,128], index: 4, kind: input, shape index: {}]   ;;  %s619_s5 = inlined_call_operand.hbm [shape: bf16[128,128], index: 5, kind: input, shape index: {}]   ;;  %s620_s6 = inlined_call_operand.vmem [shape: f32[1,128], index: 6, kind: input, shape index: {}]   ;;  %s621_s7 = inlined_call_operand.hbm [shape: f32[8,128], index: 7, kind: output, shape index: {}]  }
   0x1   :  { %13 = vsyncpa [#allocation6], 0 }
   0x2   :  { %14 = vsyncpa [#allocation9], 0  ;;  %s31_s26 = sshll.u32 %s615_s1, 4  ;;  %s32_s26 = int_to_ptr.hbm [resolvable:$true] %s31_s26 }
   0x3   :  { %15 = vsyncpa [#allocation4], 0  ;;  %s543_s27 = smov [#allocation5]   ;;  %s21_s8 = sshll.u32 %s614_s0, 4  ;;  %s22_s8 = int_to_ptr.hbm [resolvable:$true] %s21_s8 }
   0x4   :  { %s33_s28 = sshll.u32 %s543_s27, 4  ;;  %s544_s9 = smov 64   ;;  %s34_s28 = int_to_ptr.vmem [resolvable:$true] %s33_s28 }
   0x5   :  { %s545_s10 = smov 4   ;;  %s546_s11 = smov [#allocation2]  }
   0x6   :  { %39 = dma.hbm_to_vmem [thread:$0]  %s32_s26, 256, %s34_s28, [#allocation6], %s544_s9, %s544_s9, %s545_s10  }
   0x7   :  { %s23_s12 = sshll.u32 %s546_s11, 4  ;;  %s46_s15 = sshll.u32 %s617_s3, 4  ;;  %s24_s12 = int_to_ptr.vmem [resolvable:$true] %s23_s12  ;;  %s47_s15 = int_to_ptr.hbm [resolvable:$true] %s46_s15 }
   0x8   :  { %26 = dma.hbm_to_vmem [thread:$0]  %s22_s8, 128, %s24_s12, [#allocation3]  }
   0x9   :  { %s61_s17 = sshll.u32 %s619_s5, 4  ;;  %s547_s18 = smov [#allocation7]   ;;  %s62_s17 = int_to_ptr.hbm [resolvable:$true] %s61_s17 }
   0xa   :  { %s48_s19 = sshll.u32 %s547_s18, 4  ;;  %s548_s0 = smov [#allocation8]   ;;  %s49_s19 = int_to_ptr.vmem [resolvable:$true] %s48_s19 }
   0xb   :  { %54 = dma.hbm_to_vmem [thread:$0]  %s47_s15, 1024, %s49_s19, [#allocation6], %s544_s9, %s544_s9, %s545_s10  }
   0xc   :  { %s63_s20 = sshll.u32 %s548_s0, 4  ;;  %s64_s20 = int_to_ptr.vmem [resolvable:$true] %s63_s20 }
   0xd   :  { %69 = dma.hbm_to_vmem [thread:$0]  %s62_s17, 1024, %s64_s20, [#allocation9], %s544_s9, %s544_s9, %s545_s10  }
   0xe   :  { %535 = dma.done.wait [#allocation3], 128  }
   0xf   :  { %536 = vsyncadd [#allocation3], 4294967168 }
  0x10   :  { %537 = dma.done.wait [#allocation6], 1280  }
  0x11   :  { %538 = vsyncadd [#allocation6], 4294966016 }
  0x12   :  { %539 = dma.done.wait [#allocation9], 1024  }
  0x13   :  { %540 = vsyncadd [#allocation9], 4294966272  ;;  %v388_v0 = vld [vmem:[#allocation5 + $0x8] sm:$0xff]  ;;  %v387_v2 = vld [vmem:[#allocation5] sm:$0xff]  ;;  %vm111_vm0 = vcmask 261120   ;;  %s549_s24 = smov [#allocation10]  }
  0x14   :  { %v396_v1 = vld [vmem:[#allocation7 + $0x38] sm:$0xff]  ;;  %121 = vmatpush.bf16.msra.mxu0 %v388_v0  ;;  %v89_v3 = vld [vmem:[#allocation2] sm:$0xff]  ;;  %v395_v4 = vld [vmem:[#allocation7 + $0x30] sm:$0xff]  ;;  %s300_s25 = sshll.u32 %s549_s24, 4  ;;  %s302_s28 = sshll.u32 %s621_s7, 4  ;;  %s301_s25 = int_to_ptr.vmem [resolvable:$true] %s300_s25  ;;  %s303_s28 = int_to_ptr.hbm [resolvable:$true] %s302_s28 }
  0x15   :  { %198 = vmatpush.bf16.msra.mxu1 %v396_v1  ;;  %v95_v5 = vpack.c.bf16 %v89_v3, %v89_v3  ;;  %v394_v6 = vld [vmem:[#allocation7 + $0x28] sm:$0xff]  ;;  %v393_v7 = vld [vmem:[#allocation7 + $0x20] sm:$0xff]  ;;  %v392_v8 = vld [vmem:[#allocation7 + $0x18] sm:$0xff] }
  0x16   :  { %v391_v9 = vld [vmem:[#allocation7 + $0x10] sm:$0xff]  ;;  %v390_v10 = vld [vmem:[#allocation7 + $0x8] sm:$0xff]  ;;  %v389_v11 = vld [vmem:[#allocation7] sm:$0xff] }
  0x17   :  { %v404_v12 = vld [vmem:[#allocation8 + $0x38] sm:$0xff]  ;;  %v403_v13 = vld [vmem:[#allocation8 + $0x30] sm:$0xff]  ;;  %v402_v14 = vld [vmem:[#allocation8 + $0x28] sm:$0xff] }
  0x18   :  { %122 = vmatpush.bf16.msra.mxu0 %v387_v2  ;;  %281 = vmatpush.bf16.msra.mxu2 %v404_v12  ;;  %v401_v15 = vld [vmem:[#allocation8 + $0x20] sm:$0xff]  ;;  %v400_v16 = vld [vmem:[#allocation8 + $0x18] sm:$0xff]  ;;  %v399_v17 = vld [vmem:[#allocation8 + $0x10] sm:$0xff] }
  0x19   :  { %199 = vmatpush.bf16.msra.mxu1 %v395_v4  ;;  %v412_v18 = vld [vmem:[%s616_s2] ss:$0 sm:$0xff]  ;;  %v397_v25 = vld [vmem:[#allocation8] sm:$0xff] }
  0x1a   :  { %v398_v24 = vld [vmem:[#allocation8 + $0x8] sm:$0xff] }
  0x1b   :  { %322 = vmatmul.msk.bf16.vlgmr.msra.gmra.mxu0 %vm111_vm0, %v95_v5  ;;  %v413_v26 = vld [vmem:[%s618_s4] ss:$0 sm:$0xff] }
  0x1c   :  { %282 = vmatpush.bf16.msra.mxu2 %v403_v13  ;;  %v414_v32 = vld [vmem:[%s620_s6] ss:$0 sm:$0xff] }
  0x1d   :  { %200 = vmatpush.bf16.msra.mxu1 %v394_v6 }
  0x20   :  { %283 = vmatpush.bf16.msra.mxu2 %v402_v14 }
  0x21   :  { %201 = vmatpush.bf16.msra.mxu1 %v393_v7 }
  0x24   :  { %284 = vmatpush.bf16.msra.mxu2 %v401_v15 }
  0x25   :  { %202 = vmatpush.bf16.msra.mxu1 %v392_v8 }
  0x28   :  { %285 = vmatpush.bf16.msra.mxu2 %v400_v16 }
  0x29   :  { %203 = vmatpush.bf16.msra.mxu1 %v391_v9 }
  0x2c   :  { %286 = vmatpush.bf16.msra.mxu2 %v399_v17 }
  0x2d   :  { %204 = vmatpush.bf16.msra.mxu1 %v390_v10 }
  0x30   :  { %287 = vmatpush.bf16.msra.mxu2 %v398_v24 }
  0x31   :  { %205 = vmatpush.bf16.msra.mxu1 %v389_v11 }
  0x34   :  { %288 = vmatpush.bf16.msra.mxu2 %v397_v25 }
  0x98   :  { %v124_v19 = vpop.f32.mrf.mxu0 }
  0x99   :  { %v125_v20 = vadd.f32 %v412_v18, %v124_v19 }
  0x9b   :  { %v128_v21 = vmax.f32 %v125_v20, 0.0 }
  0x9d   :  { %v146_v22 = vpack.c.bf16 %v128_v21, %v128_v21 }
  0x9f   :  { %206 = vmatmul.bf16.vlgmr.msra.gmra.mxu1 %v146_v22 }
  0xa0   :  { %v126_v23 = vpop.f32.mrf.mxu0 }
 0x11c   :  { %v207_v27 = vpop.f32.mrf.mxu1 }
 0x11d   :  { %v208_v28 = vadd.f32 %v413_v26, %v207_v27 }
 0x11f   :  { %v211_v29 = vmax.f32 %v208_v28, 0.0 }
 0x121   :  { %v229_v30 = vpack.c.bf16 %v211_v29, %v211_v29 }
 0x123   :  { %289 = vmatmul.bf16.vlgmr.msra.gmra.mxu2 %v229_v30 }
 0x124   :  { %v209_v31 = vpop.f32.mrf.mxu1 }
 0x1a6   :  { %v290_v33 = vpop.f32.mrf.mxu2 }
 0x1a7   :  { %v291_v34 = vadd.f32 %v414_v32, %v290_v33 }
 0x1a9   :  { %294 = vst [vmem:[#allocation10] sm:$0xff] %v291_v34 }
 0x1aa   :  { %305 = dma.vmem_to_hbm [thread:$0]  %s301_s25, 128, %s303_s28, [#allocation4]  }
 0x1ae   :  { %v292_v35 = vpop.f32.mrf.mxu2 }
 0x1af   :  { %541 = dma.done.wait [#allocation4], 128  }
 0x1b0   :  { %542 = vsyncadd [#allocation4], 4294967168 }
 0x1b1   :  { %310 = vsyncpa [#allocation3], 1 }
 0x1b2   :  { %311 = vsyncpa [#allocation6], 1 }
 0x1b3   :  { %312 = vsyncpa [#allocation9], 1 }
 0x1b4   :  { %313 = vsyncpa [#allocation4], 1 }

</bundles_post_ra>
